<compile_context>
chip_gen: v7x
topology: tpu7x:2x2x1
jax: 0.10.0
libtpu: 0.0.40
codegen_flags: <defaults>
</compile_context>

<pallas_src>
import functools

import jax
import jax.numpy as jnp
from jax import lax
from jax.experimental import pallas as pl
from jax.experimental.pallas import tpu as pltpu

EPS = 1e-5
NEG_SLOPE = 0.2
_MIB = 1 << 20


# ----------------------------- kernels ---------------------------------------

def _conv_stats_kernel(w_ref, p_ref, y_ref, s1_ref, s2_ref):
    """One M-tile: (Cout,K) @ (K,TM) conv matmul (bf16 in, f32 MXU accumulate),
    bf16 store of the conv output, and per-channel sum / sum-of-squares
    accumulated into the per-split grid-resident (1,Cout,1) outputs."""
    @pl.when(pl.program_id(1) == 0)
    def _():
        s1_ref[...] = jnp.zeros_like(s1_ref)
        s2_ref[...] = jnp.zeros_like(s2_ref)

    y = jnp.dot(w_ref[...], p_ref[...], preferred_element_type=jnp.float32)
    y_ref[...] = y.astype(y_ref.dtype)                      # bf16 intermediate

    # Cross-lane reduces run on the XLU (idle next to the MXU); accumulators are
    # resident across the inner ("arbitrary") M axis, one per parallel split.
    s1_ref[...] += jnp.sum(y, axis=-1, keepdims=True)[None]
    s2_ref[...] += jnp.sum(y * y, axis=-1, keepdims=True)[None]


def _bn_lrelu_kernel(scale_ref, offset_ref, y_ref, o_ref, *, nb, thw):
    """Fused BN affine (one FMA) + LeakyReLU(0.2) on a lane-dense tile covering
    `nb` images x `thw` spatial columns; writes straight into (N, Cout, HWp)."""
    z = y_ref[...].astype(jnp.float32) * scale_ref[...] + offset_ref[...]
    z = jnp.where(z > 0, z, NEG_SLOPE * z)
    for b in range(nb):                                     # static, small
        o_ref[b] = z[:, b * thw:(b + 1) * thw]


# ----------------------------- helpers ----------------------------------------

def _round_up(x, m):
    return (x + m - 1) // m * m


def _largest_divisor_leq(n, limit):
    for d in range(max(1, min(n, limit)), 0, -1):
        if n % d == 0:
            return d
    return 1


def _largest_128_divisor_leq(n, limit):
    """Largest multiple of 128 that divides n (n itself a multiple of 128)."""
    best = 128
    d = 128
    top = min(n, limit)
    while d <= top:
        if n % d == 0:
            best = d
        d += 128
    return best


def _vmem_limit_bytes():
    """Generation-aware scoped-VMEM limit: big tiles on v5e/v6e (128 MiB
    physical), capped with >=16 MiB headroom under v7x's 64 MiB physical."""
    try:
        cap = getattr(pltpu.get_tpu_info(), "vmem_capacity_bytes", None)
    except Exception:
        cap = None
    if not cap:
        cap = 64 * _MIB                       # conservative: assume v7x
    return int(max(32 * _MIB, min(int(cap) - 16 * _MIB, 100 * _MIB)))


# ----------------------------- forward ----------------------------------------

def dcgan_conv_forward(x, weight, bias, gamma, beta):
    """Conv2d(nin,nout,4,2,1) -> BatchNorm2d (train mode) -> LeakyReLU(0.2).

    x: (N, Cin, H, W) f32, weight: (Cout, Cin, 4, 4), bias/gamma/beta: (Cout,).
    Returns (N, Cout, H//2, W//2) f32 in NCHW (matching the PyTorch module).
    """
    N, Cin, H, W = x.shape
    Cout = weight.shape[0]
    KH = KW = 4
    stride = 2
    Ho = (H + 2 - KH) // stride + 1
    Wo = (W + 2 - KW) // stride + 1
    K = Cin * KH * KW
    HW = Ho * Wo
    HWp = _round_up(HW, 128)          # per-image lane padding (often a no-op)
    M_img = N * HWp

    # Conv bias is exactly cancelled by the train-mode BN mean subtraction.
    del bias

    vmem_limit = _vmem_limit_bytes()
    budget = vmem_limit - 12 * _MIB   # slack for Mosaic-internal scratch

    # ---- glue: im2col in bf16, emitted directly as (K, N, Ho, Wo): no transpose.
    # TODO(synk): fold the (kh,kw) accumulation into pass 1 (shifted in-kernel
    # reads of a space-to-depth'd x) so the 4x-inflated patch matrix is never
    # materialised in HBM at all.
    x_bf = x.astype(jnp.bfloat16)
    patches = lax.conv_general_dilated_patches(
        x_bf, filter_shape=(KH, KW), window_strides=(stride, stride),
        padding=((1, 1), (1, 1)),
        dimension_numbers=("NCHW", "OIHW", "CNHW"))        # (K, N, Ho, Wo)
    p = patches.reshape(K, N, HW)
    if HWp != HW:                                           # zero lane-pad per image
        p = jnp.pad(p, ((0, 0), (0, 0), (0, HWp - HW)))
    p = p.reshape(K, M_img)

    # ---- pass-1 tiling: biggest TM that fits the VMEM budget ---------------------
    # per-step VMEM ~ 4*TM*(K + Cout)   (double-buffered bf16 p-in + bf16 y-out)
    #              + 4*Cout*K           (double-buffered resident bf16 weight).
    tm_cap = max(128, (budget - 4 * Cout * K) // (4 * (K + Cout)))
    TM = min(_round_up(M_img, 128), (tm_cap // 128) * 128, 16384)
    n_tiles = -(-M_img // TM)
    NSPLIT = 2 if n_tiles >= 2 else 1      # outer "parallel" axis -> v7x megacore
    M_total = _round_up(M_img, NSPLIT * TM)
    n_inner = M_total // (NSPLIT * TM)
    if M_total != M_img:                   # zero tile-pad (keeps BN stats exact)
        p = jnp.pad(p, ((0, 0), (0, M_total - M_img)))

    w_t = weight.reshape(Cout, K).astype(jnp.bfloat16)

    # ---- pass 1: conv-as-matmul + per-channel partial sum / sum-of-squares -------
    y_t, s1, s2 = pl.pallas_call(
        _conv_stats_kernel,
        out_shape=(
            jax.ShapeDtypeStruct((Cout, M_total), jnp.bfloat16),   # bf16 intermediate
            jax.ShapeDtypeStruct((NSPLIT, Cout, 1), jnp.float32),
            jax.ShapeDtypeStruct((NSPLIT, Cout, 1), jnp.float32),
        ),
        grid_spec=pltpu.PrefetchScalarGridSpec(
            num_scalar_prefetch=0,
            grid=(NSPLIT, n_inner),
            in_specs=[
                # resident weight; its default double buffer is counted in `budget`
                pl.BlockSpec((Cout, K), lambda c, i: (0, 0)),
                pl.BlockSpec((K, TM), lambda c, i: (0, c * n_inner + i)),
            ],
            out_specs=[
                pl.BlockSpec((Cout, TM), lambda c, i: (0, c * n_inner + i)),
                pl.BlockSpec((1, Cout, 1), lambda c, i: (c, 0, 0)),
                pl.BlockSpec((1, Cout, 1), lambda c, i: (c, 0, 0)),
            ],
        ),
        compiler_params=pltpu.CompilerParams(
            dimension_semantics=("parallel", "arbitrary"),
            vmem_limit_bytes=vmem_limit,
        ),
    )(w_t, p)

    # ---- tiny per-channel finalize in plain JAX ----------------------------------
    cnt = jnp.float32(N * HW)
    ssum = jnp.sum(s1[:, :, 0], axis=0)
    ssq = jnp.sum(s2[:, :, 0], axis=0)
    mean = ssum / cnt
    # NOTE: E[y^2] - mean^2 in f32 can lose precision when |mean| >> std at very
    # large N*Ho*Wo; acceptable at the bf16-input tolerance targeted here.
    var = jnp.maximum(ssq / cnt - mean * mean, 0.0)         # biased (train-mode BN)
    inv_std = lax.rsqrt(var + EPS)
    scale = (gamma * inv_std).reshape(Cout, 1).astype(jnp.float32)
    offset = (beta - gamma * mean * inv_std).reshape(Cout, 1).astype(jnp.float32)

    # ---- pass-2 tiling: its own (larger) tile; writes NCHW-layout output directly
    cols_cap = max(128, (budget // (12 * Cout)) // 128 * 128)  # bf16-in + f32-out, 2x buf
    if cols_cap >= HWp:
        THW = HWp
        NB = _largest_divisor_leq(N, max(1, cols_cap // HWp))  # images per step
    else:
        THW = _largest_128_divisor_leq(HWp, cols_cap)
        NB = 1
    hw_blocks = HWp // THW

    out_p = pl.pallas_call(
        functools.partial(_bn_lrelu_kernel, nb=NB, thw=THW),
        out_shape=jax.ShapeDtypeStruct((N, Cout, HWp), jnp.float32),
        grid_spec=pltpu.PrefetchScalarGridSpec(
            num_scalar_prefetch=0,
            grid=(N // NB, hw_blocks),
            in_specs=[
                pl.BlockSpec((Cout, 1), lambda n, j: (0, 0)),
                pl.BlockSpec((Cout, 1), lambda n, j: (0, 0)),
                pl.BlockSpec((Cout, NB * THW),
                             lambda n, j: (0, n * hw_blocks + j)),
            ],
            out_specs=pl.BlockSpec((NB, Cout, THW), lambda n, j: (n, 0, j)),
        ),
        compiler_params=pltpu.CompilerParams(
            dimension_semantics=("parallel", "parallel"),   # megacore on v7x
            vmem_limit_bytes=vmem_limit,
        ),
    )(scale, offset, y_t)

    # Free relayout: drop the per-image lane pad (no-op when HWp == Ho*Wo) and
    # split the spatial dim -> NCHW without any transpose.
    out = out_p if HWp == HW else out_p[:, :, :HW]
    return out.reshape(N, Cout, Ho, Wo)


# ----------------------------- reference & test --------------------------------

def _reference(x, weight, bias, gamma, beta):
    # Pure-JAX f32 reference: Conv2d(4,2,1) + train-mode BN + LeakyReLU(0.2).
    y = lax.conv_general_dilated(
        x, weight, window_strides=(2, 2), padding=((1, 1), (1, 1)),
        dimension_numbers=("NCHW", "OIHW", "NCHW"))
    y = y + bias.reshape(1, -1, 1, 1)
    mean = jnp.mean(y, axis=(0, 2, 3), keepdims=True)
    var = jnp.mean((y - mean) ** 2, axis=(0, 2, 3), keepdims=True)
    yh = (y - mean) * lax.rsqrt(var + EPS)
    yb = gamma.reshape(1, -1, 1, 1) * yh + beta.reshape(1, -1, 1, 1)
    return jnp.where(yb > 0, yb, NEG_SLOPE * yb)


if __name__ == "__main__":
    # Small shapes consistent with the module: nin=4, nout=8, spatial 16x16.
    N, Cin, H, W = 2, 4, 16, 16
    Cout = 8

    key = jax.random.PRNGKey(0)
    kx, kw, kb, kg, kbe = jax.random.split(key, 5)
    x = jax.random.normal(kx, (N, Cin, H, W), dtype=jnp.float32)
    weight = 0.1 * jax.random.normal(kw, (Cout, Cin, 4, 4), dtype=jnp.float32)
    bias = 0.1 * jax.random.normal(kb, (Cout,), dtype=jnp.float32)
    gamma = 1.0 + 0.1 * jax.random.normal(kg, (Cout,), dtype=jnp.float32)
    beta = 0.1 * jax.random.normal(kbe, (Cout,), dtype=jnp.float32)

    out = dcgan_conv_forward(x, weight, bias, gamma, beta)
    out = jax.block_until_ready(out)

    ref = _reference(x, weight, bias, gamma, beta)
    assert out.shape == (N, Cout, H // 2, W // 2), out.shape
    # bf16 matmul inputs / bf16 intermediate with f32 accumulation -> small
    # relative error vs the f32 reference.
    assert jnp.allclose(out, ref, rtol=2e-2, atol=2e-2), "mismatch vs reference"

    print("KERNEL_OK")
</pallas_src>

<mosaic_0001>
module attributes {stable_mosaic.version = 11 : i64} {
  func.func @_conv_stats_kernel(%arg0: i32, %arg1: i32, %arg2: memref<8x64xbf16, #tpu.memory_space<vmem>>, %arg3: memref<64x256xbf16, #tpu.memory_space<vmem>>, %arg4: memref<8x256xbf16, #tpu.memory_space<vmem>>, %arg5: memref<1x8x1xf32, #tpu.memory_space<vmem>>, %arg6: memref<1x8x1xf32, #tpu.memory_space<vmem>>) attributes {dimension_semantics = [#tpu.dimension_semantics<parallel>, #tpu.dimension_semantics<arbitrary>], iteration_bounds = array<i64: 1, 1>, scalar_prefetch = 0 : i64, scratch_operands = 0 : i64, tpu.core_type = #tpu.core_type<tc>, window_params = [{pipeline_mode = #tpu.pipeline_mode<synchronous>, transform_indices = @transform_0, window_bounds = array<i64: 8, 64>}, {transform_indices = @transform_1, window_bounds = array<i64: 64, 256>}, {transform_indices = @transform_2, window_bounds = array<i64: 8, 256>}, {transform_indices = @transform_3, window_bounds = array<i64: 1, 8, 1>}, {transform_indices = @transform_4, window_bounds = array<i64: 1, 8, 1>}]} {
    %c0_i32 = arith.constant 0 : i32
    %0 = arith.cmpi eq, %arg1, %c0_i32 : i32
    %1 = arith.extui %0 : i1 to i32
    %c0_i32_0 = arith.constant 0 : i32
    %2 = arith.cmpi ne, %1, %c0_i32_0 : i32
    scf.if %2 {
      %cst_20 = arith.constant 0.000000e+00 : f32
      %21 = vector.broadcast %cst_20 : f32 to vector<1x8x1xf32>
      %c0_21 = arith.constant 0 : index
      %c0_22 = arith.constant 0 : index
      %c0_23 = arith.constant 0 : index
      %22 = vector.load %arg5[%c0_21, %c0_22, %c0_23] : memref<1x8x1xf32, #tpu.memory_space<vmem>>, vector<1x8x1xf32>
      tpu.vector_store %arg5[%c0_21, %c0_22, %c0_23], %21 {strides = array<i32>} : memref<1x8x1xf32, #tpu.memory_space<vmem>>, vector<1x8x1xf32>,
      %cst_24 = arith.constant 0.000000e+00 : f32
      %23 = vector.broadcast %cst_24 : f32 to vector<1x8x1xf32>
      %c0_25 = arith.constant 0 : index
      %c0_26 = arith.constant 0 : index
      %c0_27 = arith.constant 0 : index
      %24 = vector.load %arg6[%c0_25, %c0_26, %c0_27] : memref<1x8x1xf32, #tpu.memory_space<vmem>>, vector<1x8x1xf32>
      tpu.vector_store %arg6[%c0_25, %c0_26, %c0_27], %23 {strides = array<i32>} : memref<1x8x1xf32, #tpu.memory_space<vmem>>, vector<1x8x1xf32>,
    } else {
    }
    %c0 = arith.constant 0 : index
    %c0_1 = arith.constant 0 : index
    %3 = vector.load %arg2[%c0, %c0_1] : memref<8x64xbf16, #tpu.memory_space<vmem>>, vector<8x64xbf16>
    %c0_2 = arith.constant 0 : index
    %c0_3 = arith.constant 0 : index
    %4 = vector.load %arg3[%c0_2, %c0_3] : memref<64x256xbf16, #tpu.memory_space<vmem>>, vector<64x256xbf16>
    %cst = arith.constant dense<0.000000e+00> : vector<8x256xf32>
    %5 = tpu.matmul %3, %4, %cst {dimension_numbers = #tpu.dot_dimension_numbers<[1], [0], [0], [1], [0, 0, 1, 1], [], []>} : vector<8x64xbf16>, vector<64x256xbf16>, vector<8x256xf32> -> vector<8x256xf32>
    %6 = arith.truncf %5 : vector<8x256xf32> to vector<8x256xbf16>
    %c0_4 = arith.constant 0 : index
    %c0_5 = arith.constant 0 : index
    %7 = vector.load %arg4[%c0_4, %c0_5] : memref<8x256xbf16, #tpu.memory_space<vmem>>, vector<8x256xbf16>
    tpu.vector_store %arg4[%c0_4, %c0_5], %6 {strides = array<i32>} : memref<8x256xbf16, #tpu.memory_space<vmem>>, vector<8x256xbf16>,
    %c0_6 = arith.constant 0 : index
    %c0_7 = arith.constant 0 : index
    %c0_8 = arith.constant 0 : index
    %8 = vector.load %arg5[%c0_6, %c0_7, %c0_8] : memref<1x8x1xf32, #tpu.memory_space<vmem>>, vector<1x8x1xf32>
    %cst_9 = arith.constant dense<0.000000e+00> : vector<8xf32>
    %9 = vector.multi_reduction <add>, %5, %cst_9 [1] : vector<8x256xf32> to vector<8xf32>
    %10 = vector.shape_cast %9 : vector<8xf32> to vector<8x1xf32>
    %11 = vector.shape_cast %10 : vector<8x1xf32> to vector<1x8x1xf32>
    %12 = arith.addf %8, %11 : vector<1x8x1xf32>
    %c0_10 = arith.constant 0 : index
    %c0_11 = arith.constant 0 : index
    %c0_12 = arith.constant 0 : index
    %13 = vector.load %arg5[%c0_10, %c0_11, %c0_12] : memref<1x8x1xf32, #tpu.memory_space<vmem>>, vector<1x8x1xf32>
    tpu.vector_store %arg5[%c0_10, %c0_11, %c0_12], %12 {strides = array<i32>} : memref<1x8x1xf32, #tpu.memory_space<vmem>>, vector<1x8x1xf32>,
    %c0_13 = arith.constant 0 : index
    %c0_14 = arith.constant 0 : index
    %c0_15 = arith.constant 0 : index
    %14 = vector.load %arg6[%c0_13, %c0_14, %c0_15] : memref<1x8x1xf32, #tpu.memory_space<vmem>>, vector<1x8x1xf32>
    %15 = arith.mulf %5, %5 : vector<8x256xf32>
    %cst_16 = arith.constant dense<0.000000e+00> : vector<8xf32>
    %16 = vector.multi_reduction <add>, %15, %cst_16 [1] : vector<8x256xf32> to vector<8xf32>
    %17 = vector.shape_cast %16 : vector<8xf32> to vector<8x1xf32>
    %18 = vector.shape_cast %17 : vector<8x1xf32> to vector<1x8x1xf32>
    %19 = arith.addf %14, %18 : vector<1x8x1xf32>
    %c0_17 = arith.constant 0 : index
    %c0_18 = arith.constant 0 : index
    %c0_19 = arith.constant 0 : index
    %20 = vector.load %arg6[%c0_17, %c0_18, %c0_19] : memref<1x8x1xf32, #tpu.memory_space<vmem>>, vector<1x8x1xf32>
    tpu.vector_store %arg6[%c0_17, %c0_18, %c0_19], %19 {strides = array<i32>} : memref<1x8x1xf32, #tpu.memory_space<vmem>>, vector<1x8x1xf32>,
    return
  }
  func.func @transform_0(%arg0: i32, %arg1: i32) -> (i32, i32) {
    %c0_i32 = arith.constant 0 : i32
    %c0_i32_0 = arith.constant 0 : i32
    %c0_i32_1 = arith.constant 0 : i32
    return %c0_i32, %c0_i32_0 : i32, i32
  }
  func.func @transform_1(%arg0: i32, %arg1: i32) -> (i32, i32) {
    %c1_i32 = arith.constant 1 : i32
    %0 = arith.muli %arg0, %c1_i32 : i32
    %1 = arith.addi %0, %arg1 : i32
    %c0_i32 = arith.constant 0 : i32
    %c0_i32_0 = arith.constant 0 : i32
    return %c0_i32, %1 : i32, i32
  }
  func.func @transform_2(%arg0: i32, %arg1: i32) -> (i32, i32) {
    %c1_i32 = arith.constant 1 : i32
    %0 = arith.muli %arg0, %c1_i32 : i32
    %1 = arith.addi %0, %arg1 : i32
    %c0_i32 = arith.constant 0 : i32
    %c0_i32_0 = arith.constant 0 : i32
    return %c0_i32, %1 : i32, i32
  }
  func.func @transform_3(%arg0: i32, %arg1: i32) -> (i32, i32, i32) {
    %c0_i32 = arith.constant 0 : i32
    %c0_i32_0 = arith.constant 0 : i32
    %c0_i32_1 = arith.constant 0 : i32
    return %arg0, %c0_i32, %c0_i32_0 : i32, i32, i32
  }
  func.func @transform_4(%arg0: i32, %arg1: i32) -> (i32, i32, i32) {
    %c0_i32 = arith.constant 0 : i32
    %c0_i32_0 = arith.constant 0 : i32
    %c0_i32_1 = arith.constant 0 : i32
    return %arg0, %c0_i32, %c0_i32_0 : i32, i32, i32
  }
}

</mosaic_0001>

<bundles_post_ra>
// kernel: tpu_custom_call.1
= control target key start
LH: loop header
LB: loop body
LE: loop exit
PB: predicated region body
PF: predicated region fallthrough
CT: control target
= control target key end

     0   :  { %10 = vsyncpa [#allocation3], 0  ;;  %s402_s0 = inlined_call_operand.hbm [shape: bf16[8,64], index: 0, kind: input, shape index: {}]   ;;  %s403_s1 = inlined_call_operand.hbm [shape: bf16[64,256], index: 1, kind: input, shape index: {}]   ;;  %s404_s2 = inlined_call_operand.hbm [shape: bf16[8,256], index: 2, kind: output, shape index: {0}]   ;;  %s405_s3 = inlined_call_operand.vmem [shape: f32[1,8,1], index: 3, kind: output, shape index: {1}]   ;;  %s406_s4 = inlined_call_operand.vmem [shape: f32[1,8,1], index: 4, kind: output, shape index: {2}]  }
   0x1   :  { %11 = vsyncpa [#allocation6], 0 }
   0x2   :  { %12 = vsyncpa [#allocation4], 0  ;;  %s305_s15 = smov [#allocation2]   ;;  %s306_s17 = smov [#allocation5]  }
   0x3   :  { %s19_s16 = sshll.u32 %s305_s15, 4  ;;  %s32_s18 = sshll.u32 %s306_s17, 4  ;;  %s20_s16 = int_to_ptr.vmem [resolvable:$true] %s19_s16  ;;  %s337_s18 = int_to_ptr.vmem [resolvable:$true] %s32_s18 }
   0x4   :  { %s233_s21 = scalar_lea.hbm %s402_s0, 64 }
   0x5   :  { %p234_p0 = scmp.ne.s32.totalorder %s402_s0, %s233_s21  ;;  %p237_p1 = scmp.lt.u32.totalorder %s233_s21, %s402_s0 }
   0x7   :  { %p239_p2 = pnand %p237_p1, %p234_p0 }
   0x9   :  { %242 = shalt.err (!%p239_p2)
}
   0xa   :  { %s243_s26 = scalar_lea.vmem %s20_s16, 64  ;;  %p248_p4 = scmp.lt.s32.totalorder %s20_s16, %s20_s16 }
   0xb   :  { %p244_p3 = scmp.ne.s32.totalorder %s20_s16, %s243_s26  ;;  %p249_p5 = scmp.lt.s32.totalorder %s243_s26, %s243_s26 }
   0xd   :  { %p250_p6 = por %p249_p5, %p248_p4 }
   0xf   :  { %p251_p7 = pnand %p250_p6, %p244_p3 }
  0x11   :  { %254 = shalt.err (!%p251_p7)
}
  0x12   :  { %22 = dma.hbm_to_vmem [thread:$0]  %s402_s0, 64, %s20_s16, [#allocation3]  }
  0x13   :  { %s255_s5 = scalar_lea.hbm %s403_s1, 1024 }
  0x14   :  { %p256_p8 = scmp.ne.s32.totalorder %s403_s1, %s255_s5  ;;  %p259_p9 = scmp.lt.u32.totalorder %s255_s5, %s403_s1 }
  0x16   :  { %p261_p10 = pnand %p259_p9, %p256_p8 }
  0x18   :  { %264 = shalt.err (!%p261_p10)
}
  0x19   :  { %s265_s10 = scalar_lea.vmem %s337_s18, 1024  ;;  %p270_p12 = scmp.lt.s32.totalorder %s337_s18, %s337_s18 }
  0x1a   :  { %p266_p11 = scmp.ne.s32.totalorder %s337_s18, %s265_s10  ;;  %p271_p13 = scmp.lt.s32.totalorder %s265_s10, %s265_s10 }
  0x1c   :  { %p272_p0 = por %p271_p13, %p270_p12 }
  0x1e   :  { %p273_p1 = pnand %p272_p0, %p266_p11 }
  0x20   :  { %276 = shalt.err (!%p273_p1)
}
  0x21   :  { %s307_s0 = smov 128   ;;  %s308_s11 = smov 8  }
  0x22   :  { %38 = dma.hbm_to_vmem [thread:$0]  %s403_s1, 1024, %s337_s18, [#allocation6], %s307_s0, %s307_s0, %s308_s11  }
  0x23   :  { %299 = dma.done.wait [#allocation3], 64  }
  0x24   :  { %300 = vsyncadd [#allocation3], 4294967232 }
  0x25   :  { %301 = dma.done.wait [#allocation6], 1024  }
  0x26   :  { %302 = vsyncadd [#allocation6], 4294966272  ;;  %v309_v0 = vmov 0   ;;  %v221_v1 = vld [vmem:[#allocation5 + $0x4] ss:$8 sps:$4 sm:$0xff]   ;;  %vm106_vm0 = vcmask 523264  }
  0x27   :  { %142 = vmatprep.mubr.bf16.mxu0 %v309_v0  ;;  %v223_v2 = vld [vmem:[#allocation5] ss:$8 sps:$4 sm:$0xff]   ;;  %110 = vmatprep.subr.bf16.mxu0 %v221_v1  ;;  %v224_v3 = vld [vmem:[#allocation5 + $0x14] ss:$8 sps:$4 sm:$0xff]   ;;  %v226_v4 = vld [vmem:[#allocation5 + $0x10] ss:$8 sps:$4 sm:$0xff]  }
  0x28   :  { %111 = vmatpush1.bf16.msra.mxu0 %v223_v2  ;;  %v227_v5 = vld [vmem:[#allocation5 + $0x24] ss:$8 sps:$4 sm:$0xff]   ;;  %v229_v6 = vld [vmem:[#allocation5 + $0x20] ss:$8 sps:$4 sm:$0xff]   ;;  %v230_v7 = vld [vmem:[#allocation5 + $0x34] ss:$8 sps:$4 sm:$0xff]  }
  0x29   :  { %112 = vmatprep.subr.bf16.mxu0 %v224_v3  ;;  %v232_v8 = vld [vmem:[#allocation5 + $0x30] ss:$8 sps:$4 sm:$0xff]   ;;  %v57_v9 = vld [vmem:[#allocation2] sm:$0xf]  ;;  %vm54_vm1 = vcmask 7168   ;;  %v310_v10 = vmov 0.0  }
  0x2a   :  { %55 = vst.msk [vmem:[%s405_s3] sm:$0xff] %vm54_vm1, %v310_v10  ;;  %56 = vst.msk [vmem:[%s406_s4] sm:$0xff] %vm54_vm1, %v310_v10  ;;  %s311_s17 = smov [#allocation7]  }
  0x2b   :  { %s185_s18 = sshll.u32 %s311_s17, 4  ;;  %s186_s18 = int_to_ptr.vmem [resolvable:$true] %s185_s18 }
  0x2c   :  { %113 = vmatpush1.bf16.msra.mxu0 %v226_v4  ;;  %s277_s19 = scalar_lea.vmem %s186_s18, 128  ;;  %p282_p3 = scmp.lt.s32.totalorder %s186_s18, %s186_s18 }
  0x2d   :  { %114 = vmatprep.subr.bf16.mxu0 %v227_v5  ;;  %p278_p2 = scmp.ne.s32.totalorder %s186_s18, %s277_s19  ;;  %p283_p4 = scmp.lt.s32.totalorder %s277_s19, %s277_s19 }
  0x2f   :  { %p284_p5 = por %p283_p4, %p282_p3 }
  0x30   :  { %115 = vmatpush1.bf16.msra.mxu0 %v229_v6 }
  0x31   :  { %116 = vmatprep.subr.bf16.mxu0 %v230_v7  ;;  %p285_p6 = pnand %p284_p5, %p278_p2 }
  0x34   :  { %117 = vmatpush1.bf16.msra.mxu0 %v232_v8 }
  0x37   :  { %211 = vmatmul.mubr.msk.bf16.vlgmr.msra.gmra.mrb[0].mxu0 %vm106_vm0, %v57_v9 }
 0x10a   :  { %v144_v11 = vpop.f32.mrb[0].mxu0 }
 0x10b   :  { %v146_v12 = vpop.f32.mrb[1].mxu0  ;;  %v168_v13 = vmul.f32 %v144_v11, %v144_v11 }
 0x10c   :  { %v213_v14 = vpack.c.bf16 %v146_v12, %v144_v11  ;;  %v148_v15 = vpop.f32.mrb[2].mxu0  ;;  %v161_v16 = vadd.f32 %v146_v12, %v144_v11  ;;  %v169_v17 = vmul.f32 %v146_v12, %v146_v12 }
 0x10d   :  { %v149_v18 = vpop.f32.mrb[3].mxu0 }
 0x10e   :  { %159 = vst [vmem:[#allocation7] sm:$0xff] %v213_v14  ;;  %162 = vadd.xlane.f32.xlu0 %v161_v16  ;;  %v170_v19 = vadd.f32 %v169_v17, %v168_v13 }
 0x112   :  { %171 = vadd.xlane.f32.xlu0 %v170_v19 }
 0x113   :  { %288 = shalt.err (!%p285_p6)
}
 0x114   :  { %s289_s22 = scalar_lea.hbm %s404_s2, 128 }
 0x115   :  { %p290_p7 = scmp.ne.s32.totalorder %s404_s2, %s289_s22  ;;  %p293_p8 = scmp.lt.u32.totalorder %s289_s22, %s404_s2 }
 0x117   :  { %p295_p9 = pnand %p293_p8, %p290_p7 }
 0x119   :  { %298 = shalt.err (!%p295_p9)
}
 0x11a   :  { %188 = dma.vmem_to_hbm [thread:$0]  %s186_s18, 128, %s404_s2, [#allocation4]   ;;  %v160_v20 = vld [vmem:[%s405_s3] sm:$0xff] }
 0x11b   :  { %v167_v23 = vld [vmem:[%s406_s4] sm:$0xff] }
 0x19b   :  { %v163_v21 = vpop.xlane.xlu0 %162 }
 0x19c   :  { %v164_v22 = vadd.f32 %v163_v21, %v160_v20 }
 0x19e   :  { %166 = vst.msk [vmem:[%s405_s3] sm:$0xff] %vm54_vm1, %v164_v22 }
 0x19f   :  { %v172_v24 = vpop.xlane.xlu0 %171 }
 0x1a0   :  { %v173_v25 = vadd.f32 %v172_v24, %v167_v23 }
 0x1a2   :  { %174 = vst.msk [vmem:[%s406_s4] sm:$0xff] %vm54_vm1, %v173_v25 }
 0x1a3   :  { %303 = dma.done.wait [#allocation4], 128  }
 0x1a4   :  { %304 = vsyncadd [#allocation4], 4294967168 }
 0x1a5   :  { %200 = vsyncpa [#allocation3], 1 }
 0x1a6   :  { %201 = vsyncpa [#allocation6], 1 }
 0x1a7   :  { %202 = vsyncpa [#allocation4], 1 }

</bundles_post_ra>
